<compile_context>
chip_gen: v5e
topology: v5e:2x2
jax: 0.10.0
libtpu: 0.0.40
codegen_flags: <defaults>
</compile_context>

<pallas_src>
import jax
import jax.numpy as jnp
from jax.experimental import pallas as pl
from jax.experimental.pallas import tpu as pltpu

_LANE = 128


def _identity_copy_kernel(x_ref, o_ref):
    # Pure pass-through: load the tile and store it unchanged.
    o_ref[...] = x_ref[...]


def _round_up(a, b):
    return ((a + b - 1) // b) * b


def _tpu_generation():
    """Best-effort TPU generation detection (None if unknown / not TPU)."""
    try:
        kind = jax.devices()[0].device_kind.lower()
    except Exception:
        return None
    if "7" in kind:
        return 7
    if "v6" in kind or "6e" in kind or "trillium" in kind:
        return 6
    if "v5" in kind:
        return 5
    return None


def _copy_config():
    gen = _tpu_generation()
    if gen is not None and gen >= 7:
        # v7x: ~3.2 TB/s HBM -> 8 MiB tiles keep the ~0.35 us/step pipeline
        # overhead under ~10%.  2 inputs-bufs + 2 output-bufs x 8 MiB = 32 MiB,
        # so raise the scoped VMEM limit a bit (physical VMEM is 64 MiB).
        return dict(tile_bytes=8 << 20, vmem_limit=40 << 20, want_two_steps=True)
    if gen == 6:
        # v6e: ~1.4 TB/s -> 4 MiB tiles; 16 MiB of double-buffered in+out
        # sits comfortably inside the 32 MiB default scoped limit.
        return dict(tile_bytes=4 << 20, vmem_limit=None, want_two_steps=False)
    # v5e (16 MiB default scoped limit) and unknown chips: stay at 2 MiB —
    # per-step overhead is already <7% at v5e bandwidth.
    return dict(tile_bytes=2 << 20, vmem_limit=None, want_two_steps=False)


def _tiled_copy_2d(x2d, cfg):
    """Streaming copy of a lane-dense 2D slab (last dim <= 128, full extent)."""
    M, W = x2d.shape
    dtype = x2d.dtype
    itemsize = jnp.dtype(dtype).itemsize
    # Sublane packing multiple: 8 for 32-bit, 16 for 16-bit, 32 for 8-bit.
    sublane = max(8, 32 // itemsize)

    rows_for_target = max(1, cfg["tile_bytes"] // max(1, W * itemsize))
    tm = min(M, rows_for_target)
    if tm < M:
        tm = max(sublane, (tm // sublane) * sublane)
    elif cfg["want_two_steps"] and M > sublane:
        # v7x has 2 TensorCores: a 1-step grid leaves half the chip's HBM
        # path idle.  Split mid-size copies into (at least) 2 parallel steps.
        half = _round_up(-(-M // 2), sublane)
        if half < M:
            tm = half

    grid = (pl.cdiv(M, tm),)

    compiler_kwargs = dict(dimension_semantics=("parallel",))
    if cfg["vmem_limit"] is not None:
        compiler_kwargs["vmem_limit_bytes"] = cfg["vmem_limit"]

    return pl.pallas_call(
        _identity_copy_kernel,
        out_shape=jax.ShapeDtypeStruct((M, W), dtype),
        grid=grid,
        in_specs=[pl.BlockSpec((tm, W), lambda i: (i, 0))],
        out_specs=pl.BlockSpec((tm, W), lambda i: (i, 0)),
        cost_estimate=pl.CostEstimate(
            flops=0, transcendentals=0, bytes_accessed=2 * M * W * itemsize),
        compiler_params=pltpu.CompilerParams(**compiler_kwargs),
    )(x2d)


def _small_copy_2d(x2d):
    """Whole-array copy for tiny / ragged leftovers (block == full extent)."""
    return pl.pallas_call(
        _identity_copy_kernel,
        out_shape=jax.ShapeDtypeStruct(x2d.shape, x2d.dtype),
    )(x2d)


def _pallas_identity_copy(x):
    """Materialize a fresh copy of `x` through a Pallas streaming-copy kernel."""
    orig_shape = x.shape
    dtype = x.dtype
    total = x.size
    if total == 0:
        return x

    cfg = _copy_config()
    itemsize = jnp.dtype(dtype).itemsize

    # Preferred path: lane-dense element slab (rows, 128).
    if total % _LANE == 0:
        y2d = _tiled_copy_2d(x.reshape(total // _LANE, _LANE), cfg)
        return y2d.reshape(orig_shape)

    # Element count is lane-sparse but byte count is lane-dense: copy the raw
    # bytes as a (rows, 128) uint8 slab so every store is a full-width vst.
    total_bytes = total * itemsize
    if (total_bytes % _LANE == 0 and dtype != jnp.bool_
            and itemsize in (1, 2, 4, 8)):
        flat_u8 = jax.lax.bitcast_convert_type(x, jnp.uint8).reshape(-1)
        y_u8 = _tiled_copy_2d(flat_u8.reshape(total_bytes // _LANE, _LANE), cfg)
        if itemsize == 1:
            return jax.lax.bitcast_convert_type(
                y_u8.reshape(orig_shape), dtype)
        return jax.lax.bitcast_convert_type(
            y_u8.reshape(orig_shape + (itemsize,)), dtype)

    # Truly ragged: stream the lane-dense prefix, copy the <128-element tail
    # with a tiny whole-block kernel, and stitch them back together.
    flat = x.reshape(-1)
    prefix_len = (total // _LANE) * _LANE
    parts = []
    if prefix_len > 0:
        y_pref = _tiled_copy_2d(
            flat[:prefix_len].reshape(prefix_len // _LANE, _LANE), cfg)
        parts.append(y_pref.reshape(-1))
    tail_len = total - prefix_len
    if tail_len > 0:
        y_tail = _small_copy_2d(flat[prefix_len:].reshape(1, tail_len))
        parts.append(y_tail.reshape(-1))
    y_flat = parts[0] if len(parts) == 1 else jnp.concatenate(parts)
    return y_flat.reshape(orig_shape)


def identity_dict_forward(x, output_features=False, ghost_mask=None,
                          *, materialize=False):
    """IdentityDict.forward.

    Default (materialize=False) is the zero-cost true identity: returns the
    input array itself (and (x, x) when output_features=True), exactly like
    the PyTorch module.  materialize=True returns a genuinely fresh buffer
    produced by the Pallas streaming-copy kernel.
    """
    del ghost_mask  # accepted for API parity, unused (as in PyTorch)
    y = _pallas_identity_copy(x) if materialize else x
    if output_features:
        # encode(x) == x for IdentityDict, so features share the same buffer.
        return y, y
    return y


def identity_dict_encode(x):
    return x


def identity_dict_decode(f):
    return f


def hacked_forward_for_sfc(x, *, materialize=False):
    return identity_dict_forward(x, output_features=True,
                                 materialize=materialize)


if __name__ == "__main__":
    root = jax.random.PRNGKey(0)
    k0, k1, k2 = jax.random.split(root, 3)

    batch, seq, hidden = 2, 8, 32   # activation_dim = 32
    x = jax.random.normal(k0, (batch, seq, hidden), dtype=jnp.float32)

    # 1) Default forward: pure pass-through (no HBM traffic at all).
    y = jax.block_until_ready(identity_dict_forward(x))
    assert y.shape == x.shape and y.dtype == x.dtype
    assert bool(jnp.all(y == x))

    # 2) Materialized forward: lane-dense (rows, 128) Pallas streaming copy.
    y_copy = jax.block_until_ready(identity_dict_forward(x, materialize=True))
    assert y_copy.shape == x.shape and y_copy.dtype == x.dtype
    assert bool(jnp.all(y_copy == x))

    # 3) forward(x, output_features=True) -> (x, x), both paths.
    out, feats = hacked_forward_for_sfc(x)
    assert bool(jnp.all(out == x)) and bool(jnp.all(feats == x))
    out_m, feats_m = hacked_forward_for_sfc(x, materialize=True)
    out_m = jax.block_until_ready(out_m)
    feats_m = jax.block_until_ready(feats_m)
    assert bool(jnp.all(out_m == x)) and bool(jnp.all(feats_m == x))

    # 4) encode / decode are the identity.
    assert bool(jnp.all(identity_dict_encode(x) == x))
    assert bool(jnp.all(identity_dict_decode(x) == x))

    # 5) Byte-bitcast path: total % 128 != 0 but total_bytes % 128 == 0.
    x2 = jax.random.normal(k1, (2, 8, 36), dtype=jnp.float32)
    y2 = jax.block_until_ready(_pallas_identity_copy(x2))
    assert y2.shape == x2.shape and bool(jnp.all(y2 == x2))

    # 6) Ragged path: lane-dense prefix + tiny tail kernel.
    x3 = jax.random.normal(k2, (9, 35), dtype=jnp.float32)
    y3 = jax.block_until_ready(_pallas_identity_copy(x3))
    assert y3.shape == x3.shape and bool(jnp.all(y3 == x3))

    print("KERNEL_OK")
</pallas_src>

<mosaic_0001>
module attributes {stable_mosaic.version = 11 : i64} {
  func.func @_identity_copy_kernel(%arg0: i32, %arg1: memref<4x128xf32, #tpu.memory_space<vmem>>, %arg2: memref<4x128xf32, #tpu.memory_space<vmem>>) attributes {dimension_semantics = [#tpu.dimension_semantics<parallel>], iteration_bounds = array<i64: 1>, scalar_prefetch = 0 : i64, scratch_operands = 0 : i64, tpu.core_type = #tpu.core_type<tc>, window_params = [{transform_indices = @transform_0, window_bounds = array<i64: 4, 128>}, {transform_indices = @transform_1, window_bounds = array<i64: 4, 128>}]} {
    %c0 = arith.constant 0 : index
    %c0_0 = arith.constant 0 : index
    %0 = vector.load %arg1[%c0, %c0_0] : memref<4x128xf32, #tpu.memory_space<vmem>>, vector<4x128xf32>
    %c0_1 = arith.constant 0 : index
    %c0_2 = arith.constant 0 : index
    %1 = vector.load %arg2[%c0_1, %c0_2] : memref<4x128xf32, #tpu.memory_space<vmem>>, vector<4x128xf32>
    tpu.vector_store %arg2[%c0_1, %c0_2], %0 {strides = array<i32>} : memref<4x128xf32, #tpu.memory_space<vmem>>, vector<4x128xf32>,
    return
  }
  func.func @transform_0(%arg0: i32) -> (i32, i32) {
    %c0_i32 = arith.constant 0 : i32
    %c0_i32_0 = arith.constant 0 : i32
    return %arg0, %c0_i32 : i32, i32
  }
  func.func @transform_1(%arg0: i32) -> (i32, i32) {
    %c0_i32 = arith.constant 0 : i32
    %c0_i32_0 = arith.constant 0 : i32
    return %arg0, %c0_i32 : i32, i32
  }
}

</mosaic_0001>

<bundles_post_ra>
// kernel: tpu_custom_call.1
= control target key start
LH: loop header
LB: loop body
LE: loop exit
PB: predicated region body
PF: predicated region fallthrough
CT: control target
= control target key end

     0   :  { %6 = vsyncpa [#allocation3], 0  ;;  %s114_s0 = inlined_call_operand.hbm [shape: f32[4,128], index: 0, kind: input, shape index: {}]   ;;  %s115_s1 = inlined_call_operand.hbm [shape: f32[4,128], index: 1, kind: output, shape index: {}]  }
   0x1   :  { %7 = vsyncpa [#allocation4], 0  ;;  %s13_s8 = sshll.u32 %s114_s0, 4  ;;  %s96_s9 = smov [#allocation2]   ;;  %s14_s8 = int_to_ptr.hbm [resolvable:$true] %s13_s8 }
   0x2   :  { %s15_s10 = sshll.u32 %s96_s9, 4  ;;  %s16_s10 = int_to_ptr.vmem [resolvable:$true] %s15_s10 }
   0x3   :  { %18 = dma.hbm_to_vmem [thread:$0]  %s14_s8, 64, %s16_s10, [#allocation3]  }
   0x4   :  { %92 = dma.done.wait [#allocation3], 64  }
   0x5   :  { %93 = vsyncadd [#allocation3], 4294967232  ;;  %s97_s11 = smov [#allocation5]   ;;  %s32_s15 = sshll.u32 %s115_s1, 4  ;;  %v23_v0 = vld [vmem:[#allocation2] sm:$0xf]  ;;  %s33_s15 = int_to_ptr.hbm [resolvable:$true] %s32_s15 }
   0x6   :  { %s30_s12 = sshll.u32 %s97_s11, 4  ;;  %24 = vst [vmem:[#allocation5] sm:$0xf] %v23_v0  ;;  %s31_s12 = int_to_ptr.vmem [resolvable:$true] %s30_s12 }
   0x7   :  { %35 = dma.vmem_to_hbm [thread:$0]  %s31_s12, 64, %s33_s15, [#allocation4]  }
   0x8   :  { %94 = dma.done.wait [#allocation4], 64  }
   0x9   :  { %95 = vsyncadd [#allocation4], 4294967232 }
   0xa   :  { %40 = vsyncpa [#allocation3], 1 }
   0xb   :  { %41 = vsyncpa [#allocation4], 1 }

</bundles_post_ra>
